<compile_context>
chip_gen: v5e
topology: v5e:2x2
jax: 0.10.0
libtpu: 0.0.40
codegen_flags: <defaults>
</compile_context>

<pallas_src>
import jax
import jax.numpy as jnp
from jax.experimental import pallas as pl
from jax.experimental.pallas import tpu as pltpu


def _round_up(x, m):
    return ((x + m - 1) // m) * m


def _at_partials_kernel(fs_ref, ft_ref, saa_ref, sbb_ref, sab_ref):
    """Accumulate Saa, Sbb, Sab over the spatial-tile (arbitrary) grid axis."""
    h = pl.program_id(1)

    @pl.when(h == 0)
    def _init():
        saa_ref[...] = jnp.zeros_like(saa_ref)
        sbb_ref[...] = jnp.zeros_like(sbb_ref)
        sab_ref[...] = jnp.zeros_like(sab_ref)

    fs = fs_ref[...].astype(jnp.float32)        # (1, Cs, T)
    ft = ft_ref[...].astype(jnp.float32)        # (1, Ct, T)

    # attention map tile: mean of f^2 over the (full) channel axis -> (1, T)
    ms = jnp.mean(fs * fs, axis=1)
    mt = jnp.mean(ft * ft, axis=1)

    # spatial partial sums (exact under zero-padding of the lane axis)
    saa_ref[...] = saa_ref[...] + jnp.sum(ms * ms)
    sbb_ref[...] = sbb_ref[...] + jnp.sum(mt * mt)
    sab_ref[...] = sab_ref[...] + jnp.sum(ms * mt)


def _adaptive_avg_pool2d(x, out_hw):
    """Plain-JAX glue: adaptive avg pool for the evenly-divisible case (matches
    F.adaptive_avg_pool2d when H % out_hw == 0)."""
    B, C, H, W = x.shape
    # TODO(synk): general (non-divisible) adaptive pooling bins not implemented.
    assert H % out_hw == 0 and W % out_hw == 0, "only divisible adaptive pooling supported"
    kh, kw = H // out_hw, W // out_hw
    return x.reshape(B, C, out_hw, kh, out_hw, kw).mean(axis=(3, 5))


@jax.jit
def at_loss_pallas(f_s, f_t):
    """Single (f_s, f_t) pair -> scalar attention-transfer loss."""
    s_H = f_s.shape[2]
    t_H = f_t.shape[2]
    if s_H > t_H:
        f_s = _adaptive_avg_pool2d(f_s, t_H)
    elif s_H < t_H:
        f_t = _adaptive_avg_pool2d(f_t, s_H)

    B, Cs, H, W = f_s.shape
    Bt, Ct, _, _ = f_t.shape
    assert B == Bt
    HW = H * W

    # Keep native dtype (no f32 upcast copy in HBM); kernel casts per-tile.
    fs = f_s.reshape(B, Cs, HW)
    ft = f_t.reshape(B, Ct, HW)

    # Choose a lane tile (multiple of 128) so the double-buffered input
    # footprint stays around <=8 MiB regardless of feature-map size.
    budget = 8 * 1024 * 1024
    per_lane_bytes = 2 * (Cs * fs.dtype.itemsize + Ct * ft.dtype.itemsize)
    t_hw = max(128, (budget // per_lane_bytes) // 128 * 128)
    t_hw = min(t_hw, _round_up(HW, 128))

    # Zero-pad HW so every spatial block is full; exact for Saa/Sbb/Sab.
    hw_pad = _round_up(HW, t_hw)
    if hw_pad != HW:
        fs = jnp.pad(fs, ((0, 0), (0, 0), (0, hw_pad - HW)))
        ft = jnp.pad(ft, ((0, 0), (0, 0), (0, hw_pad - HW)))
    n_hw = hw_pad // t_hw

    out_part = jax.ShapeDtypeStruct((B, 1, 1), jnp.float32)
    saa, sbb, sab = pl.pallas_call(
        _at_partials_kernel,
        out_shape=(out_part, out_part, out_part),
        grid_spec=pltpu.PrefetchScalarGridSpec(
            num_scalar_prefetch=0,
            grid=(B, n_hw),
            in_specs=[
                pl.BlockSpec((1, Cs, t_hw), lambda b, h: (b, 0, h)),
                pl.BlockSpec((1, Ct, t_hw), lambda b, h: (b, 0, h)),
            ],
            out_specs=[
                pl.BlockSpec((1, 1, 1), lambda b, h: (b, 0, 0)),
                pl.BlockSpec((1, 1, 1), lambda b, h: (b, 0, 0)),
                pl.BlockSpec((1, 1, 1), lambda b, h: (b, 0, 0)),
            ],
        ),
        compiler_params=pltpu.CompilerParams(
            # batch is race-free per-output-block -> parallel (megacore);
            # spatial axis accumulates -> arbitrary.
            dimension_semantics=("parallel", "arbitrary"),
            vmem_limit_bytes=32 * 1024 * 1024,
        ),
    )(fs, ft)

    # Finalize in plain JAX on B-sized vectors (true HW divisor, not padded).
    saa = saa.reshape(B)
    sbb = sbb.reshape(B)
    sab = sab.reshape(B)
    eps = jnp.float32(1e-12)
    ns = jnp.maximum(jnp.sqrt(saa), eps)   # F.normalize: x / max(||x||_2, eps)
    nt = jnp.maximum(jnp.sqrt(sbb), eps)
    per_b = saa / (ns * ns) + sbb / (nt * nt) - 2.0 * sab / (ns * nt)
    return jnp.sum(per_b) / jnp.float32(B * HW)


def at_loss_forward(g_s, g_t):
    """ATLoss.forward: list of per-layer scalar losses."""
    return [at_loss_pallas(fs, ft) for fs, ft in zip(g_s, g_t)]


# ---------------------------------------------------------------------------
# Pure-JAX reference (mirrors the PyTorch code) for a correctness check.
# ---------------------------------------------------------------------------
def _at_ref(f):
    m = jnp.mean(f.astype(jnp.float32) ** 2, axis=1).reshape(f.shape[0], -1)
    n = jnp.maximum(jnp.linalg.norm(m, axis=1, keepdims=True), 1e-12)
    return m / n


def _at_loss_ref(f_s, f_t):
    s_H, t_H = f_s.shape[2], f_t.shape[2]
    if s_H > t_H:
        f_s = _adaptive_avg_pool2d(f_s, t_H)
    elif s_H < t_H:
        f_t = _adaptive_avg_pool2d(f_t, s_H)
    d = _at_ref(f_s) - _at_ref(f_t)
    return jnp.mean(d * d)


if __name__ == "__main__":
    key = jax.random.PRNGKey(0)
    ks = jax.random.split(key, 6)

    # Student / teacher feature-map lists (NCHW).
    #   pair 0: equal spatial sizes, different channel counts (f32)
    #   pair 1: exercises the adaptive-avg-pool branch (teacher 16x16 -> 8x8)
    #   pair 2: native-bf16 streaming path
    g_s = [
        jax.random.normal(ks[0], (2, 4, 16, 16), dtype=jnp.float32),
        jax.random.normal(ks[1], (2, 8, 8, 8), dtype=jnp.float32),
        jax.random.normal(ks[2], (2, 8, 8, 8), dtype=jnp.bfloat16),
    ]
    g_t = [
        jax.random.normal(ks[3], (2, 6, 16, 16), dtype=jnp.float32),
        jax.random.normal(ks[4], (2, 8, 16, 16), dtype=jnp.float32),
        jax.random.normal(ks[5], (2, 4, 8, 8), dtype=jnp.bfloat16),
    ]

    losses = at_loss_forward(g_s, g_t)
    losses = [jax.block_until_ready(l) for l in losses]

    refs = [_at_loss_ref(fs, ft) for fs, ft in zip(g_s, g_t)]
    for got, ref in zip(losses, refs):
        assert jnp.allclose(got, ref, rtol=1e-4, atol=1e-6), (got, ref)

    print("KERNEL_OK")
</pallas_src>

<mosaic_0001>
module attributes {stable_mosaic.version = 11 : i64} {
  func.func @_at_partials_kernel(%arg0: i32, %arg1: i32, %arg2: memref<1x4x256xf32, #tpu.memory_space<vmem>>, %arg3: memref<1x6x256xf32, #tpu.memory_space<vmem>>, %arg4: memref<1x1x1xf32, #tpu.memory_space<vmem>>, %arg5: memref<1x1x1xf32, #tpu.memory_space<vmem>>, %arg6: memref<1x1x1xf32, #tpu.memory_space<vmem>>) attributes {dimension_semantics = [#tpu.dimension_semantics<parallel>, #tpu.dimension_semantics<arbitrary>], iteration_bounds = array<i64: 2, 1>, scalar_prefetch = 0 : i64, scratch_operands = 0 : i64, tpu.core_type = #tpu.core_type<tc>, window_params = [{transform_indices = @transform_0, window_bounds = array<i64: 1, 4, 256>}, {transform_indices = @transform_1, window_bounds = array<i64: 1, 6, 256>}, {transform_indices = @transform_2, window_bounds = array<i64: 1, 1, 1>}, {transform_indices = @transform_3, window_bounds = array<i64: 1, 1, 1>}, {transform_indices = @transform_4, window_bounds = array<i64: 1, 1, 1>}]} {
    %c0_i32 = arith.constant 0 : i32
    %0 = arith.cmpi eq, %arg1, %c0_i32 : i32
    %1 = arith.extui %0 : i1 to i32
    %c0_i32_0 = arith.constant 0 : i32
    %2 = arith.cmpi ne, %1, %c0_i32_0 : i32
    scf.if %2 {
      %cst_30 = arith.constant 0.000000e+00 : f32
      %40 = vector.broadcast %cst_30 : f32 to vector<1x1x1xf32>
      %c0_31 = arith.constant 0 : index
      %c0_32 = arith.constant 0 : index
      %c0_33 = arith.constant 0 : index
      %41 = vector.load %arg4[%c0_31, %c0_32, %c0_33] : memref<1x1x1xf32, #tpu.memory_space<vmem>>, vector<1x1x1xf32>
      tpu.vector_store %arg4[%c0_31, %c0_32, %c0_33], %40 {strides = array<i32>} : memref<1x1x1xf32, #tpu.memory_space<vmem>>, vector<1x1x1xf32>,
      %cst_34 = arith.constant 0.000000e+00 : f32
      %42 = vector.broadcast %cst_34 : f32 to vector<1x1x1xf32>
      %c0_35 = arith.constant 0 : index
      %c0_36 = arith.constant 0 : index
      %c0_37 = arith.constant 0 : index
      %43 = vector.load %arg5[%c0_35, %c0_36, %c0_37] : memref<1x1x1xf32, #tpu.memory_space<vmem>>, vector<1x1x1xf32>
      tpu.vector_store %arg5[%c0_35, %c0_36, %c0_37], %42 {strides = array<i32>} : memref<1x1x1xf32, #tpu.memory_space<vmem>>, vector<1x1x1xf32>,
      %cst_38 = arith.constant 0.000000e+00 : f32
      %44 = vector.broadcast %cst_38 : f32 to vector<1x1x1xf32>
      %c0_39 = arith.constant 0 : index
      %c0_40 = arith.constant 0 : index
      %c0_41 = arith.constant 0 : index
      %45 = vector.load %arg6[%c0_39, %c0_40, %c0_41] : memref<1x1x1xf32, #tpu.memory_space<vmem>>, vector<1x1x1xf32>
      tpu.vector_store %arg6[%c0_39, %c0_40, %c0_41], %44 {strides = array<i32>} : memref<1x1x1xf32, #tpu.memory_space<vmem>>, vector<1x1x1xf32>,
    } else {
    }
    %c0 = arith.constant 0 : index
    %c0_1 = arith.constant 0 : index
    %c0_2 = arith.constant 0 : index
    %3 = vector.load %arg2[%c0, %c0_1, %c0_2] : memref<1x4x256xf32, #tpu.memory_space<vmem>>, vector<1x4x256xf32>
    %c0_3 = arith.constant 0 : index
    %c0_4 = arith.constant 0 : index
    %c0_5 = arith.constant 0 : index
    %4 = vector.load %arg3[%c0_3, %c0_4, %c0_5] : memref<1x6x256xf32, #tpu.memory_space<vmem>>, vector<1x6x256xf32>
    %5 = arith.mulf %3, %3 : vector<1x4x256xf32>
    %cst = arith.constant dense<0.000000e+00> : vector<1x256xf32>
    %6 = vector.multi_reduction <add>, %5, %cst [1] : vector<1x4x256xf32> to vector<1x256xf32>
    %cst_6 = arith.constant 4.000000e+00 : f32
    %7 = vector.broadcast %cst_6 : f32 to vector<1x256xf32>
    %8 = arith.divf %6, %7 : vector<1x256xf32>
    %9 = arith.mulf %4, %4 : vector<1x6x256xf32>
    %cst_7 = arith.constant dense<0.000000e+00> : vector<1x256xf32>
    %10 = vector.multi_reduction <add>, %9, %cst_7 [1] : vector<1x6x256xf32> to vector<1x256xf32>
    %cst_8 = arith.constant 6.000000e+00 : f32
    %11 = vector.broadcast %cst_8 : f32 to vector<1x256xf32>
    %12 = arith.divf %10, %11 : vector<1x256xf32>
    %c0_9 = arith.constant 0 : index
    %c0_10 = arith.constant 0 : index
    %c0_11 = arith.constant 0 : index
    %13 = vector.load %arg4[%c0_9, %c0_10, %c0_11] : memref<1x1x1xf32, #tpu.memory_space<vmem>>, vector<1x1x1xf32>
    %14 = arith.mulf %8, %8 : vector<1x256xf32>
    %15 = vector.shape_cast %14 : vector<1x256xf32> to vector<1x1x256xf32>
    %cst_12 = arith.constant dense<0.000000e+00> : vector<1xf32>
    %16 = vector.multi_reduction <add>, %15, %cst_12 [1, 2] : vector<1x1x256xf32> to vector<1xf32>
    %17 = vector.shape_cast %16 : vector<1xf32> to vector<1x1x1xf32>
    %18 = vector.extract %17[0, 0, 0] : f32 from vector<1x1x1xf32>
    %19 = vector.broadcast %18 : f32 to vector<1x1x1xf32>
    %20 = arith.addf %13, %19 : vector<1x1x1xf32>
    %c0_13 = arith.constant 0 : index
    %c0_14 = arith.constant 0 : index
    %c0_15 = arith.constant 0 : index
    %21 = vector.load %arg4[%c0_13, %c0_14, %c0_15] : memref<1x1x1xf32, #tpu.memory_space<vmem>>, vector<1x1x1xf32>
    tpu.vector_store %arg4[%c0_13, %c0_14, %c0_15], %20 {strides = array<i32>} : memref<1x1x1xf32, #tpu.memory_space<vmem>>, vector<1x1x1xf32>,
    %c0_16 = arith.constant 0 : index
    %c0_17 = arith.constant 0 : index
    %c0_18 = arith.constant 0 : index
    %22 = vector.load %arg5[%c0_16, %c0_17, %c0_18] : memref<1x1x1xf32, #tpu.memory_space<vmem>>, vector<1x1x1xf32>
    %23 = arith.mulf %12, %12 : vector<1x256xf32>
    %24 = vector.shape_cast %23 : vector<1x256xf32> to vector<1x1x256xf32>
    %cst_19 = arith.constant dense<0.000000e+00> : vector<1xf32>
    %25 = vector.multi_reduction <add>, %24, %cst_19 [1, 2] : vector<1x1x256xf32> to vector<1xf32>
    %26 = vector.shape_cast %25 : vector<1xf32> to vector<1x1x1xf32>
    %27 = vector.extract %26[0, 0, 0] : f32 from vector<1x1x1xf32>
    %28 = vector.broadcast %27 : f32 to vector<1x1x1xf32>
    %29 = arith.addf %22, %28 : vector<1x1x1xf32>
    %c0_20 = arith.constant 0 : index
    %c0_21 = arith.constant 0 : index
    %c0_22 = arith.constant 0 : index
    %30 = vector.load %arg5[%c0_20, %c0_21, %c0_22] : memref<1x1x1xf32, #tpu.memory_space<vmem>>, vector<1x1x1xf32>
    tpu.vector_store %arg5[%c0_20, %c0_21, %c0_22], %29 {strides = array<i32>} : memref<1x1x1xf32, #tpu.memory_space<vmem>>, vector<1x1x1xf32>,
    %c0_23 = arith.constant 0 : index
    %c0_24 = arith.constant 0 : index
    %c0_25 = arith.constant 0 : index
    %31 = vector.load %arg6[%c0_23, %c0_24, %c0_25] : memref<1x1x1xf32, #tpu.memory_space<vmem>>, vector<1x1x1xf32>
    %32 = arith.mulf %8, %12 : vector<1x256xf32>
    %33 = vector.shape_cast %32 : vector<1x256xf32> to vector<1x1x256xf32>
    %cst_26 = arith.constant dense<0.000000e+00> : vector<1xf32>
    %34 = vector.multi_reduction <add>, %33, %cst_26 [1, 2] : vector<1x1x256xf32> to vector<1xf32>
    %35 = vector.shape_cast %34 : vector<1xf32> to vector<1x1x1xf32>
    %36 = vector.extract %35[0, 0, 0] : f32 from vector<1x1x1xf32>
    %37 = vector.broadcast %36 : f32 to vector<1x1x1xf32>
    %38 = arith.addf %31, %37 : vector<1x1x1xf32>
    %c0_27 = arith.constant 0 : index
    %c0_28 = arith.constant 0 : index
    %c0_29 = arith.constant 0 : index
    %39 = vector.load %arg6[%c0_27, %c0_28, %c0_29] : memref<1x1x1xf32, #tpu.memory_space<vmem>>, vector<1x1x1xf32>
    tpu.vector_store %arg6[%c0_27, %c0_28, %c0_29], %38 {strides = array<i32>} : memref<1x1x1xf32, #tpu.memory_space<vmem>>, vector<1x1x1xf32>,
    return
  }
  func.func @transform_0(%arg0: i32, %arg1: i32) -> (i32, i32, i32) {
    %c0_i32 = arith.constant 0 : i32
    %c0_i32_0 = arith.constant 0 : i32
    return %arg0, %c0_i32, %arg1 : i32, i32, i32
  }
  func.func @transform_1(%arg0: i32, %arg1: i32) -> (i32, i32, i32) {
    %c0_i32 = arith.constant 0 : i32
    %c0_i32_0 = arith.constant 0 : i32
    return %arg0, %c0_i32, %arg1 : i32, i32, i32
  }
  func.func @transform_2(%arg0: i32, %arg1: i32) -> (i32, i32, i32) {
    %c0_i32 = arith.constant 0 : i32
    %c0_i32_0 = arith.constant 0 : i32
    %c0_i32_1 = arith.constant 0 : i32
    return %arg0, %c0_i32, %c0_i32_0 : i32, i32, i32
  }
  func.func @transform_3(%arg0: i32, %arg1: i32) -> (i32, i32, i32) {
    %c0_i32 = arith.constant 0 : i32
    %c0_i32_0 = arith.constant 0 : i32
    %c0_i32_1 = arith.constant 0 : i32
    return %arg0, %c0_i32, %c0_i32_0 : i32, i32, i32
  }
  func.func @transform_4(%arg0: i32, %arg1: i32) -> (i32, i32, i32) {
    %c0_i32 = arith.constant 0 : i32
    %c0_i32_0 = arith.constant 0 : i32
    %c0_i32_1 = arith.constant 0 : i32
    return %arg0, %c0_i32, %c0_i32_0 : i32, i32, i32
  }
}

</mosaic_0001>

<bundles_post_ra>
// kernel: at_loss_pallas.1
= control target key start
LH: loop header
LB: loop body
LE: loop exit
PB: predicated region body
PF: predicated region fallthrough
CT: control target
= control target key end

     0   :  { %s630_s15 = smov 0   ;;  %s632_s16 = smov 0   ;;  %s706_s0 = inlined_call_operand.vmem [shape: f32[2,4,256], index: 0, kind: input, shape index: {}]   ;;  %s707_s1 = inlined_call_operand.vmem [shape: f32[2,6,256], index: 1, kind: input, shape index: {}]   ;;  %s708_s2 = inlined_call_operand.vmem [shape: f32[2,1,1], index: 2, kind: output, shape index: {0}]   ;;  %s709_s3 = inlined_call_operand.vmem [shape: f32[2,1,1], index: 3, kind: output, shape index: {1}]   ;;  %s710_s4 = inlined_call_operand.vmem [shape: f32[2,1,1], index: 4, kind: output, shape index: {2}]  }
   0x1   :  { %s634_s17 = smov 0  }
   0x2 LB: > { %s27_s18 = sadd.s32 1, %s596_s16  ;;  %p532_p0 = scmp.ge.s32.totalorder %s600_s17, 1  ;;  %s600_s17 = sphi %s634_s17, %s15_s17   ;;  %s596_s16 = sphi %s632_s16, %s712_s16   ;;  %s592_s15 = sphi %s630_s15, %s711_s15  }
   0x3   : > { %p29_p1 = scmp.ge.s32.totalorder %s27_s18, 2  ;;  %p203_p2 = scmp.lt.s32.totalorder %s600_s17, 3 }
   0x5   : > { %s714_s18 = smov (%p29_p1, %s27_s18), 0  ;;  %p204_p3 = pnand %p532_p0, %p203_p2 }
   0x6   : > { %p247_p4 = scmp.lt.s32.totalorder (!%p204_p3), %s592_s15, 1 }
   0x7   : > { %207 = sbr.rel (%p204_p3) target bundleno = 237 (0xed), region = 28 }
   0xc   : > { %v602_v0 = vmov 4.0   ;;  %s716_s15 = smov (!%p247_p4, %s592_s15), 1  ;;  %v603_v1 = vmov 6.0   ;;  %vm319_vm0 = vcmask 1045504   ;;  %vm293_vm1 = vcmask 1043456  }
   0xd   : > { %574 = vrcp.f32 %v602_v0  ;;  %s539_s19 = sshll.u32 %s716_s15, 3  ;;  %s540_s20 = sshll.u32 %s716_s15, 4  ;;  %vm346_vm4 = vcmask 1040384   ;;  %vm279_vm5 = vcmask 0  }
   0xe   : > { %576 = vrcp.f32 %v603_v1  ;;  %s254_s23 = scalar_lea.vmem %s706_s0, %s539_s19  ;;  %s264_s26 = scalar_lea.vmem %s707_s1, %s540_s20 }
   0xf   : > { %v283_v2 = vld [vmem:[%s254_s23] sm:$0xff]  ;;  %v285_v4 = vld [vmem:[%s264_s26 + $0x8] sm:$0x3f]  ;;  %s668_s29 = scalar_lea.vmem %s708_s2, %s716_s15  ;;  %s674_s6 = scalar_lea.vmem %s709_s3, %s716_s15 }
  0x10   : > { %v284_v3 = vld [vmem:[%s264_s26] sm:$0x3f]  ;;  %v286_v6 = vmul.f32 %v283_v2, %v283_v2  ;;  %v318_v8 = vmul.f32 %v285_v4, %v285_v4  ;;  %s680_s9 = scalar_lea.vmem %s710_s4, %s716_s15 }
  0x11   : > { %v317_v7 = vmul.f32 %v284_v3, %v284_v3 }
  0x12   : > { %288 = vst [vmem:[#allocation1] ss:$2 sm:$0xff] %v286_v6  ;;  %v327_v11 = vsel %vm319_vm0, %v318_v8, 0.0 }
  0x13   : > { %v575_v5 = vpop.eup %574  ;;  %v320_v10 = vsel %vm319_vm0, %v317_v7, 0.0  ;;  %v328_v14 = vrot.slane %v327_v11, 4 }
  0x14   : > { %v577_v9 = vpop.eup %576  ;;  %v321_v13 = vrot.slane %v320_v10, 4  ;;  %v309_v15 = vmul.f32 4.0, %v575_v5  ;;  %vm313_vm3 = vweird.f32 %v575_v5 }
  0x15   : > { %v335_v12 = vmul.f32 6.0, %v577_v9  ;;  %v329_v17 = vadd.f32 %v328_v14, %v327_v11  ;;  %vm339_vm2 = vweird.f32 %v577_v9 }
  0x16   : > { %v322_v16 = vadd.f32 %v321_v13, %v320_v10  ;;  %v310_v21 = vsub.f32 1.0, %v309_v15 }
  0x17   : > { %v336_v18 = vsub.f32 1.0, %v335_v12  ;;  %v330_v20 = vrot.slane %v329_v17, 2 }
  0x18   : > { %v323_v19 = vrot.slane %v322_v16, 2  ;;  %v311_v31 = vmul.f32 %v575_v5, %v310_v21 }
  0x19   : > { %v289_v22 = vld.sshfl [vmem:[#allocation1] sm:$0xff pattern:$0x75316420]  ;;  %v290_v23 = vld.sshfl [vmem:[#allocation1 + $0x8] sm:$0xff pattern:$0x75316420]  ;;  %v331_v25 = vadd.f32 %v330_v20, %v329_v17  ;;  %v337_v28 = vmul.f32 %v577_v9, %v336_v18 }
  0x1a   : > { %v324_v24 = vadd.f32 %v323_v19, %v322_v16  ;;  %v294_v26 = vsel %vm293_vm1, %v289_v22, 0.0  ;;  %v301_v27 = vsel %vm293_vm1, %v290_v23, 0.0  ;;  %v312_v39 = vadd.f32 %v575_v5, %v311_v31 }
  0x1b   : > { %v295_v29 = vrot.slane %v294_v26, 4  ;;  %v302_v30 = vrot.slane %v301_v27, 4  ;;  %v332_v35 = vrot.slane %v331_v25, 1  ;;  %v338_v36 = vadd.f32 %v577_v9, %v337_v28 }
  0x1c   : > { %v325_v34 = vrot.slane %v324_v24, 1  ;;  %v314_v47 = vsel %vm313_vm3, %v575_v5, %v312_v39  ;;  %v604_v5 = vmov 0.0  }
  0x1d   : > { %v296_v32 = vadd.f32 %v295_v29, %v294_v26  ;;  %v303_v33 = vadd.f32 %v302_v30, %v301_v27  ;;  %v333_v43 = vadd.f32 %v332_v35, %v331_v25  ;;  %v340_v44 = vsel %vm339_vm2, %v577_v9, %v338_v36  ;;  %280 = vst.msk [vmem:[%s668_s29] sm:$0x1] %vm279_vm5, %v604_v5 }
  0x1e   : > { %v326_v42 = vadd.f32 %v325_v34, %v324_v24  ;;  %281 = vst.msk [vmem:[%s674_s6] sm:$0x1] %vm279_vm5, %v604_v5 }
  0x1f   : > { %v297_v37 = vrot.slane %v296_v32, 2  ;;  %v304_v38 = vrot.slane %v303_v33, 2  ;;  %v342_v51 = vmul.f32 %v340_v44, %v333_v43  ;;  %282 = vst.msk [vmem:[%s680_s9] sm:$0x1] %vm279_vm5, %v604_v5 }
  0x20   : > { %v341_v50 = vmul.f32 %v340_v44, %v326_v42 }
  0x21   : > { %v298_v40 = vadd.f32 %v297_v37, %v296_v32  ;;  %v305_v41 = vadd.f32 %v304_v38, %v303_v33  ;;  %v365_v59 = vmul.f32 %v342_v51, %v342_v51 }
  0x22   : > { %v364_v58 = vmul.f32 %v341_v50, %v341_v50 }
  0x23   : > { %v299_v45 = vrot.slane %v298_v40, 1  ;;  %v306_v46 = vrot.slane %v305_v41, 1  ;;  %v367_v3 = vsel %vm346_vm4, %v365_v59, 0.0 }
  0x24   : > { %v366_v2 = vsel %vm346_vm4, %v364_v58, 0.0  ;;  %v343_v27 = vld [vmem:[%s668_s29] sm:$0x1] }
  0x25   : > { %v300_v48 = vadd.f32 %v299_v45, %v298_v40  ;;  %v307_v49 = vadd.f32 %v306_v46, %v305_v41  ;;  %v368_v4 = vadd.f32 %v367_v3, %v366_v2  ;;  %v363_v30 = vld [vmem:[%s674_s6] sm:$0x1] }
  0x26   : > { %v381_v31 = vld [vmem:[%s680_s9] sm:$0x1] }
  0x27   : > { %v315_v52 = vmul.f32 %v314_v47, %v300_v48  ;;  %v316_v53 = vmul.f32 %v314_v47, %v307_v49 }
  0x29   : > { %v344_v54 = vmul.f32 %v315_v52, %v315_v52  ;;  %v345_v55 = vmul.f32 %v316_v53, %v316_v53  ;;  %v382_v56 = vmul.f32 %v341_v50, %v315_v52  ;;  %v383_v57 = vmul.f32 %v342_v51, %v316_v53 }
  0x2b   : > { %v347_v60 = vsel %vm346_vm4, %v344_v54, 0.0  ;;  %v348_v61 = vsel %vm346_vm4, %v345_v55, 0.0  ;;  %v384_v62 = vsel %vm346_vm4, %v382_v56, 0.0  ;;  %v385_v63 = vsel %vm346_vm4, %v383_v57, 0.0 }
  0x2c   : > { %v349_v0 = vadd.f32 %v348_v61, %v347_v60  ;;  %v386_v1 = vadd.f32 %v385_v63, %v384_v62 }
  0x2e   : > { %350 = vadd.xlane.f32.xlu0 %v349_v0  ;;  %387 = vadd.xlane.f32.xlu1 %v386_v1 }
  0x36   : > { %369 = vadd.xlane.f32.xlu0 %v368_v4 }
  0xa1   : > { %v351_v6 = vpop.xlane.xlu0 %350  ;;  %v388_v7 = vpop.xlane.xlu1 %387 }
  0xa2   : > { %v352_v8 = vrot.slane %v351_v6, 4  ;;  %v389_v9 = vrot.slane %v388_v7, 4 }
  0xa4   : > { %v353_v10 = vadd.f32 %v352_v8, %v351_v6  ;;  %v390_v11 = vadd.f32 %v389_v9, %v388_v7 }
  0xa6   : > { %v354_v12 = vrot.slane %v353_v10, 2  ;;  %v391_v14 = vrot.slane %v390_v11, 2 }
  0xa8   : > { %v355_v13 = vadd.f32 %v354_v12, %v353_v10  ;;  %v392_v20 = vadd.f32 %v391_v14, %v390_v11 }
  0xa9   : > { %v370_v15 = vpop.xlane.xlu0 %369 }
  0xaa   : > { %v371_v16 = vrot.slane %v370_v15, 4  ;;  %v356_v17 = vrot.slane %v355_v13, 1  ;;  %v393_v23 = vrot.slane %v392_v20, 1 }
  0xac   : > { %v372_v18 = vadd.f32 %v371_v16, %v370_v15  ;;  %v357_v19 = vadd.f32 %v356_v17, %v355_v13  ;;  %v394_v26 = vadd.f32 %v393_v23, %v392_v20 }
  0xae   : > { %v373_v21 = vrot.slane %v372_v18, 2  ;;  %541 = vpush %v357_v19 }
  0xb0   : > { %v374_v22 = vadd.f32 %v373_v21, %v372_v18 }
  0xb2   : > { %v375_v24 = vrot.slane %v374_v22, 1 }
  0xb4   : > { %v376_v25 = vadd.f32 %v375_v24, %v374_v22 }
  0xb6   : > { %543 = vpush %v376_v25 }
  0xb7   : > { %545 = vpush %v394_v26 }
  0xdf   : > { %s542_s10 = spop %541 }
  0xe0   : > { %v359_v28 = vstv %s542_s10 }
  0xe1   : > { %v360_v29 = vadd.f32 %v359_v28, %v343_v27 }
  0xe3   : > { %362 = vst.msk [vmem:[%s668_s29] sm:$0x1] %vm279_vm5, %v360_v29 }
  0xe7   : > { %s544_s11 = spop %543 }
  0xe8   : > { %v378_v32 = vstv %s544_s11  ;;  %s546_s12 = spop %545 }
  0xe9   : > { %v379_v33 = vadd.f32 %v378_v32, %v363_v30  ;;  %v396_v34 = vstv %s546_s12 }
  0xea   : > { %v397_v35 = vadd.f32 %v396_v34, %v381_v31 }
  0xeb   : > { %380 = vst.msk [vmem:[%s674_s6] sm:$0x1] %vm279_vm5, %v379_v33 }
  0xec   : > { %398 = vst.msk [vmem:[%s680_s9] sm:$0x1] %vm279_vm5, %v397_v35 }
  0xed PF: > { %s15_s17 = sadd.s32 1, %s600_s17   ;;  %s711_s15 = smov %s596_s16 }
  0xee   : > { %p12_p5 = scmp.ge.s32.totalorder %s15_s17, 4   ;;  %s712_s16 = smov %s714_s18 }
  0xf0   :  { %14 = sbr.rel (!%p12_p5) target bundleno = 2 (0x2), region = 89 }

</bundles_post_ra>
